<compile_context>
chip_gen: v6e
topology: v6e:2x2x1
jax: 0.10.0
libtpu: 0.0.40
codegen_flags: <defaults>
</compile_context>

<pallas_src>
import functools

import numpy as np
import jax
import jax.numpy as jnp
from jax import lax
from jax.experimental import pallas as pl
from jax.experimental.pallas import tpu as pltpu

_MAX_SEQ_ROWS_PER_STEP = 4096          # original seq rows per grid step (before VMEM cap)
_VMEM_OUT_BUDGET_BYTES = 12 * 2**20    # double-buffered output budget (safe on v5e)


def _round_up(a, b):
    return ((a + b - 1) // b) * b


# ---------------- Pallas kernels ----------------

def _freqs_kernel(tab_ref, freqs_ref, *, fold):
    # tab_ref: (2, W) resident constants: row0 = lane->row-offset, row1 = tiled inv_freq.
    # freqs_ref: (TS, W) with W = fold*dim (lane-dense, multiple of 128 when fold > 1).
    ts, w = freqs_ref.shape
    row = pl.program_id(0) * ts + lax.broadcasted_iota(jnp.int32, (ts, w), 0)
    # int32 iota + one convert kept for lowering robustness; convert is off the store slot.
    t = row.astype(jnp.float32) * float(fold) + tab_ref[0:1, :]
    freqs_ref[...] = t * tab_ref[1:2, :]                      # single full-width store


def _freqs_xpos_kernel(tab_ref, freqs_ref, scale_ref, *, fold, half_seq):
    # tab_ref: (3, W): row0 = lane->row-offset, row1 = tiled inv_freq,
    #                  row2 = tiled log(scale)/scale_base, so scale**power == exp((t-half)*row2).
    ts, w = freqs_ref.shape
    row = pl.program_id(0) * ts + lax.broadcasted_iota(jnp.int32, (ts, w), 0)
    t = row.astype(jnp.float32) * float(fold) + tab_ref[0:1, :]
    freqs_ref[...] = t * tab_ref[1:2, :]
    scale_ref[...] = jnp.exp((t - half_seq) * tab_ref[2:3, :])  # one EUP exp / element


# ---------------- Wrapper (parameter setup is plain-JAX / numpy glue) ----------------

class SinusoidalEmbeddingsPallas:
    def __init__(self, dim, scale_base=None, use_xpos=False, theta=10000):
        assert dim % 2 == 0
        self.dim = dim
        self.use_xpos = use_xpos
        self.scale_base = scale_base
        assert not (use_xpos and scale_base is None), "scale base must be defined if using xpos"

        half = dim // 2
        ar = np.arange(0, dim, 2, dtype=np.float32)
        inv_half = (1.0 / (theta ** (ar / dim))).astype(np.float32)
        scale_half = ((ar + 0.4 * dim) / (1.4 * dim)).astype(np.float32)

        # half-width buffers (parity with the torch module's registered buffers; used by the ref)
        self.inv_freq = jnp.asarray(inv_half)
        self.scale = jnp.asarray(scale_half)

        # lane folding factor: pack `fold` consecutive seq rows into the 128-lane axis
        if dim < 128 and 128 % dim == 0:
            fold = 128 // dim
        else:
            fold = 1
        self.fold = fold
        w = fold * dim
        self.width = w

        inv_full = np.concatenate([inv_half, inv_half])                    # (dim,)
        t_off = np.repeat(np.arange(fold, dtype=np.float32), dim)          # (W,): lane -> row offset
        inv_tiled = np.tile(inv_full, fold)                                # (W,): lane -> inv_freq

        if use_xpos:
            lsb_full = np.concatenate([np.log(scale_half), np.log(scale_half)]) / float(scale_base)
            lsb_tiled = np.tile(lsb_full.astype(np.float32), fold)         # (W,)
            tables = np.stack([t_off, inv_tiled, lsb_tiled])               # (3, W)
        else:
            tables = np.stack([t_off, inv_tiled])                          # (2, W)
        self._tables = jnp.asarray(tables, dtype=jnp.float32)

    def _tile_rows(self, folded_rows, n_outs):
        """Folded rows per grid step: big tiles, VMEM-safe, and >=2 steps when non-trivial."""
        dim, fold = self.dim, self.fold
        # rows budget from original-seq-row target and the double-buffered output VMEM cap
        rows_budget = max(512, _VMEM_OUT_BUDGET_BYTES // (n_outs * 2 * dim * 4))
        max_rows = min(_MAX_SEQ_ROWS_PER_STEP, rows_budget)
        ts_r = max(8, ((max_rows // fold) // 8) * 8)
        if folded_rows < 16:
            return folded_rows                       # tiny table: single full-extent block
        # keep at least two grid steps so v7x's two TensorCores both get work
        half_split = _round_up(pl.cdiv(folded_rows, 2), 8)
        return min(ts_r, half_split)

    def __call__(self, x):
        seq_len = x.shape[-2]
        dim, fold, w = self.dim, self.fold, self.width
        folded_rows = pl.cdiv(seq_len, fold)         # output rows in folded layout
        n_outs = 2 if self.use_xpos else 1

        ts_r = self._tile_rows(folded_rows, n_outs)
        grid = (pl.cdiv(folded_rows, ts_r),)
        cparams = pltpu.CompilerParams(dimension_semantics=("parallel",))

        tab_spec = pl.BlockSpec((self._tables.shape[0], w), lambda i: (0, 0))  # resident constants
        out_spec = pl.BlockSpec((ts_r, w), lambda i: (i, 0))
        out_sds = jax.ShapeDtypeStruct((folded_rows, w), jnp.float32)

        def unfold(y):
            if fold == 1:
                return y                             # (seq_len, dim) already
            y = y.reshape(folded_rows * fold, dim)   # row-major contiguous -> free reshape
            return y[:seq_len] if folded_rows * fold != seq_len else y

        if not self.use_xpos:
            freqs = pl.pallas_call(
                functools.partial(_freqs_kernel, fold=fold),
                out_shape=out_sds,
                grid=grid,
                in_specs=[tab_spec],
                out_specs=out_spec,
                compiler_params=cparams,
            )(self._tables)
            return unfold(freqs), jnp.ones((1,), dtype=jnp.float32)

        kernel = functools.partial(
            _freqs_xpos_kernel, fold=fold, half_seq=float(seq_len // 2))
        freqs, scale = pl.pallas_call(
            kernel,
            out_shape=(out_sds, out_sds),
            grid=grid,
            in_specs=[tab_spec],
            out_specs=(out_spec, out_spec),
            compiler_params=cparams,
        )(self._tables)
        return unfold(freqs), unfold(scale)


# ---------------- reference (plain JAX) for sanity check ----------------

def _reference(mod, x):
    seq_len = x.shape[-2]
    t = jnp.arange(seq_len, dtype=jnp.float32)
    freqs = t[:, None] * mod.inv_freq[None, :]
    freqs = jnp.concatenate([freqs, freqs], axis=-1)
    if not mod.use_xpos:
        return freqs, jnp.ones((1,), dtype=jnp.float32)
    power = (t - seq_len // 2) / mod.scale_base
    scale = mod.scale[None, :] ** power[:, None]
    scale = jnp.concatenate([scale, scale], axis=-1)
    return freqs, scale


if __name__ == "__main__":
    key = jax.random.PRNGKey(0)
    batch, seq, hidden = 2, 8, 32
    dim = 32
    x = jax.random.normal(key, (batch, seq, hidden), dtype=jnp.float32)

    # branch 1: default (no xpos), dim=32 -> fold=4, single-step grid
    mod = SinusoidalEmbeddingsPallas(dim=dim)
    freqs, ones_scale = mod(x)
    jax.block_until_ready((freqs, ones_scale))
    rf, rs = _reference(mod, x)
    assert freqs.shape == (seq, dim) and ones_scale.shape == (1,)
    assert jnp.allclose(freqs, rf, atol=1e-5), "freqs mismatch (no xpos)"
    assert jnp.allclose(ones_scale, rs), "scale mismatch (no xpos)"

    # branch 2: xpos
    mod_x = SinusoidalEmbeddingsPallas(dim=dim, scale_base=512, use_xpos=True)
    freqs2, scale2 = mod_x(x)
    jax.block_until_ready((freqs2, scale2))
    rf2, rs2 = _reference(mod_x, x)
    assert freqs2.shape == (seq, dim) and scale2.shape == (seq, dim)
    assert jnp.allclose(freqs2, rf2, atol=1e-5), "freqs mismatch (xpos)"
    assert jnp.allclose(scale2, rs2, atol=1e-5), "scale mismatch (xpos)"

    # branch 3: longer sequence, seq % fold != 0 -> multi-step grid + remainder trim
    seq_long = 3001
    x_long = jax.random.normal(key, (1, seq_long, hidden), dtype=jnp.float32)
    freqs3, scale3 = mod_x(x_long)
    jax.block_until_ready((freqs3, scale3))
    rf3, rs3 = _reference(mod_x, x_long)
    assert freqs3.shape == (seq_long, dim) and scale3.shape == (seq_long, dim)
    assert jnp.allclose(freqs3, rf3, atol=1e-4), "freqs mismatch (xpos, tiled)"
    assert jnp.allclose(scale3, rs3, atol=1e-5), "scale mismatch (xpos, tiled)"

    # branch 4: dim=64 (fold=2), odd seq -> 2-step grid, partial last block, remainder trim
    mod64 = SinusoidalEmbeddingsPallas(dim=64)
    x64 = jax.random.normal(key, (1, 37, hidden), dtype=jnp.float32)
    freqs4, ones4 = mod64(x64)
    jax.block_until_ready((freqs4, ones4))
    rf4, _ = _reference(mod64, x64)
    assert freqs4.shape == (37, 64)
    assert jnp.allclose(freqs4, rf4, atol=1e-5), "freqs mismatch (dim=64, folded)"

    print("KERNEL_OK")
</pallas_src>

<mosaic_0001>
module attributes {stable_mosaic.version = 11 : i64} {
  func.func @_freqs_kernel(%arg0: i32, %arg1: memref<2x128xf32, #tpu.memory_space<vmem>>, %arg2: memref<2x128xf32, #tpu.memory_space<vmem>>) attributes {dimension_semantics = [#tpu.dimension_semantics<parallel>], iteration_bounds = array<i64: 1>, scalar_prefetch = 0 : i64, scratch_operands = 0 : i64, tpu.core_type = #tpu.core_type<tc>, window_params = [{pipeline_mode = #tpu.pipeline_mode<synchronous>, transform_indices = @transform_0, window_bounds = array<i64: 2, 128>}, {transform_indices = @transform_1, window_bounds = array<i64: 2, 128>}]} {
    %c2_i32 = arith.constant 2 : i32
    %0 = arith.muli %arg0, %c2_i32 : i32
    %1 = tpu.iota {dimensions = array<i32: 0>} : vector<2x128xi32>
    %2 = vector.broadcast %0 : i32 to vector<2x128xi32>
    %3 = arith.addi %2, %1 : vector<2x128xi32>
    %4 = arith.sitofp %3 : vector<2x128xi32> to vector<2x128xf32>
    %cst = arith.constant 4.000000e+00 : f32
    %5 = vector.broadcast %cst : f32 to vector<2x128xf32>
    %6 = arith.mulf %4, %5 : vector<2x128xf32>
    %c0 = arith.constant 0 : index
    %c0_0 = arith.constant 0 : index
    %7 = vector.load %arg1[%c0, %c0_0] : memref<2x128xf32, #tpu.memory_space<vmem>>, vector<1x128xf32>
    %8 = vector.broadcast %7 : vector<1x128xf32> to vector<2x128xf32>
    %9 = arith.addf %6, %8 : vector<2x128xf32>
    %c1 = arith.constant 1 : index
    %c0_1 = arith.constant 0 : index
    %10 = vector.load %arg1[%c1, %c0_1] : memref<2x128xf32, #tpu.memory_space<vmem>>, vector<1x128xf32>
    %11 = vector.broadcast %10 : vector<1x128xf32> to vector<2x128xf32>
    %12 = arith.mulf %9, %11 : vector<2x128xf32>
    %c0_2 = arith.constant 0 : index
    %c0_3 = arith.constant 0 : index
    %13 = vector.load %arg2[%c0_2, %c0_3] : memref<2x128xf32, #tpu.memory_space<vmem>>, vector<2x128xf32>
    tpu.vector_store %arg2[%c0_2, %c0_3], %12 {strides = array<i32>} : memref<2x128xf32, #tpu.memory_space<vmem>>, vector<2x128xf32>,
    return
  }
  func.func @transform_0(%arg0: i32) -> (i32, i32) {
    %c0_i32 = arith.constant 0 : i32
    %c0_i32_0 = arith.constant 0 : i32
    %c0_i32_1 = arith.constant 0 : i32
    return %c0_i32, %c0_i32_0 : i32, i32
  }
  func.func @transform_1(%arg0: i32) -> (i32, i32) {
    %c0_i32 = arith.constant 0 : i32
    %c0_i32_0 = arith.constant 0 : i32
    return %arg0, %c0_i32 : i32, i32
  }
}

</mosaic_0001>

<bundles_post_ra>
// kernel: tpu_custom_call.1
= control target key start
LH: loop header
LB: loop body
LE: loop exit
PB: predicated region body
PF: predicated region fallthrough
CT: control target
= control target key end

     0   :  { %6 = vsyncpa [#allocation3], 0  ;;  %s122_s0 = inlined_call_operand.hbm [shape: f32[2,128], index: 0, kind: input, shape index: {}]   ;;  %s123_s1 = inlined_call_operand.hbm [shape: f32[2,128], index: 1, kind: output, shape index: {}]  }
   0x1   :  { %7 = vsyncpa [#allocation4], 0  ;;  %s104_s6 = smov [#allocation2]  }
   0x2   :  { %s14_s7 = sshll.u32 %s104_s6, 4  ;;  %s15_s7 = int_to_ptr.vmem [resolvable:$true] %s14_s7 }
   0x3   :  { %s68_s8 = scalar_lea.vmem %s15_s7, 32  ;;  %p73_p1 = scmp.lt.s32.totalorder %s15_s7, %s15_s7 }
   0x4   :  { %p69_p0 = scmp.ne.s32.totalorder %s15_s7, %s68_s8  ;;  %p74_p2 = scmp.lt.s32.totalorder %s68_s8, %s68_s8 }
   0x6   :  { %p75_p3 = por %p74_p2, %p73_p1 }
   0x8   :  { %p76_p4 = pnand %p75_p3, %p69_p0 }
   0xa   :  { %79 = shalt.err (!%p76_p4)
}
   0xb   :  { %17 = dma.hbm_to_vmem [thread:$0]  %s122_s0, 32, %s15_s7, [#allocation3]  }
   0xc   :  { %100 = dma.done.wait [#allocation3], 32  }
   0xd   :  { %101 = vsyncadd [#allocation3], 4294967264  ;;  %v22_v0 = vlaneseq  ;;  %v56_v4 = vld [vmem:[#allocation2] ss:$0 sm:$0xff]  ;;  %v57_v5 = vld [vmem:[#allocation2 + $0x1] ss:$0 sm:$0xff] }
   0xe   :  { %s105_s11 = smov [#allocation5]  }
   0xf   :  { %v23_v1 = vshrl.u32 %v22_v0, 7  ;;  %s47_s12 = sshll.u32 %s105_s11, 4  ;;  %s48_s12 = int_to_ptr.vmem [resolvable:$true] %s47_s12 }
  0x10   :  { %s80_s13 = scalar_lea.vmem %s48_s12, 32  ;;  %p85_p6 = scmp.lt.s32.totalorder %s48_s12, %s48_s12 }
  0x11   :  { %v26_v2 = vcvt.s32.f32 %v23_v1  ;;  %p81_p5 = scmp.ne.s32.totalorder %s48_s12, %s80_s13  ;;  %p86_p7 = scmp.lt.s32.totalorder %s80_s13, %s80_s13 }
  0x13   :  { %v27_v3 = vmul.f32 4.0, %v26_v2  ;;  %p87_p8 = por %p86_p7, %p85_p6 }
  0x15   :  { %v33_v6 = vadd.f32 %v56_v4, %v27_v3  ;;  %p88_p9 = pnand %p87_p8, %p81_p5 }
  0x17   :  { %v39_v7 = vmul.f32 %v57_v5, %v33_v6 }
  0x19   :  { %40 = vst [vmem:[#allocation5] sm:$0x3] %v39_v7 }
  0x1a   :  { %91 = shalt.err (!%p88_p9)
}
  0x1b   :  { %50 = dma.vmem_to_hbm [thread:$0]  %s48_s12, 32, %s123_s1, [#allocation4]  }
  0x1c   :  { %102 = dma.done.wait [#allocation4], 32  }
  0x1d   :  { %103 = vsyncadd [#allocation4], 4294967264 }
  0x1e   :  { %54 = vsyncpa [#allocation3], 1 }
  0x1f   :  { %55 = vsyncpa [#allocation4], 1 }

</bundles_post_ra>
